<compile_context>
chip_gen: v7x
topology: tpu7x:2x2x1
jax: 0.10.0
libtpu: 0.0.40
codegen_flags: <defaults>
</compile_context>

<pallas_src>
import jax
import jax.numpy as jnp
from jax import lax
from jax.experimental import pallas as pl
from jax.experimental.pallas import tpu as pltpu


def _pooler_kernel(x_ref, w_ref, b_ref, o_ref):
    # x_ref: [TILE_B, H]   first-token activations (input dtype, e.g. f32)
    # w_ref: [H, H]        torch Linear weight [out_features, in_features], bf16
    # b_ref: [1, H]        bias, f32
    # o_ref: [TILE_B, H]   output (input dtype)
    x = x_ref[...].astype(w_ref.dtype)          # cast tile to MXU dtype (VPU, cheap)
    w = w_ref[...]
    # y[m, n] = sum_k x[m, k] * w[n, k]  ==  x @ W.T  (no transpose op emitted;
    # contraction on the last dim of both operands -> native MXU path, f32 acc)
    y = lax.dot_general(
        x, w,
        dimension_numbers=(((1,), (1,)), ((), ())),
        preferred_element_type=jnp.float32,
    )
    y = y + b_ref[...]                          # f32 bias add (VPU)
    o_ref[...] = jnp.tanh(y).astype(o_ref.dtype)  # tanh on EUP, cast on store


def pooler_forward(hidden_states, weight, bias, *,
                   tile_b=128, compute_dtype=jnp.bfloat16):
    """hidden_states: [B, S, H], weight: [H, H] (torch layout), bias: [H] -> [B, H]."""
    B, S, H = hidden_states.shape
    assert weight.shape == (H, H) and bias.shape == (H,)
    out_dtype = hidden_states.dtype

    # Fold the token-0 slice into the DMA: reshape [B, S, H] -> [B, S*H] is
    # metadata-only; block (tile_b, H) at block index (i, 0) covers exactly
    # columns [0:H] == token 0 of each batch row.
    if H % 128 == 0 or S == 1:
        x_in = hidden_states.reshape(B, S * H)
    else:
        # Fallback for non-lane-aligned H: the (tile_b, H) block would violate
        # the (8, 128) block rule on a [B, S*H] array, so slice in the wrapper.
        x_in = hidden_states[:, 0, :]

    # Weight in MXU dtype. A real deployment stores the parameter in bf16 at
    # load time, making this a no-op (the demo below does exactly that).
    w = weight.astype(compute_dtype)
    b2d = bias.astype(jnp.float32).reshape(1, H)

    # Batch tiling: sublane-aligned tiles; single full-B tile for tiny batches.
    tile_b = min(tile_b, B)
    if tile_b != B:
        tile_b = max(8, (tile_b // 8) * 8)
    grid_b = pl.cdiv(B, tile_b)
    # NOTE: a ragged last batch tile is handled by Pallas's masked OOB stores.

    bytes_accessed = int(
        x_in.dtype.itemsize * B * H          # first-token activations
        + w.dtype.itemsize * H * H           # weight (fetched once)
        + 4 * H                              # bias
        + jnp.dtype(out_dtype).itemsize * B * H  # output
    )

    return pl.pallas_call(
        _pooler_kernel,
        out_shape=jax.ShapeDtypeStruct((B, H), out_dtype),
        grid_spec=pltpu.PrefetchScalarGridSpec(
            num_scalar_prefetch=0,
            grid=(grid_b,),
            in_specs=[
                pl.BlockSpec((tile_b, H), lambda i: (i, 0)),  # token-0 rows, tiled over B
                pl.BlockSpec((H, H), lambda i: (0, 0)),       # weight: VMEM-resident
                pl.BlockSpec((1, H), lambda i: (0, 0)),       # bias:   VMEM-resident
            ],
            out_specs=pl.BlockSpec((tile_b, H), lambda i: (i, 0)),
        ),
        compiler_params=pltpu.CompilerParams(
            # v7x: shard the batch grid across the two TensorCores.
            dimension_semantics=("parallel",),
        ),
        cost_estimate=pl.CostEstimate(
            flops=2 * B * H * H,
            transcendentals=B * H,
            bytes_accessed=bytes_accessed,
        ),
    )(x_in, w, b2d)


if __name__ == "__main__":
    key = jax.random.PRNGKey(0)
    k_x, k_w, k_b = jax.random.split(key, 3)

    # Small, TPU-aligned shapes: H multiple of 128 (lane-dense output), batch
    # large enough to exercise the batch grid (tile_b=8 -> grid of 2).
    B, S, H = 16, 8, 128

    hidden_states = jax.random.normal(k_x, (B, S, H), dtype=jnp.float32)
    weight = jax.random.normal(k_w, (H, H), dtype=jnp.float32) * 0.02
    bias = jax.random.normal(k_b, (H,), dtype=jnp.float32) * 0.02

    # "Parameter load time" cast: store the Linear weight in bf16 once so the
    # per-call path has no weight cast/transpose ops.
    weight_bf16 = weight.astype(jnp.bfloat16)

    out = pooler_forward(hidden_states, weight_bf16, bias, tile_b=8)
    out = jax.block_until_ready(out)
    assert out.shape == (B, H)

    first = hidden_states[:, 0, :]

    # Reference with the same bf16 operand rounding, exact f32 accumulation —
    # matches the kernel's bf16 MXU / f32-accumulate path up to summation order.
    ref_bf16 = jnp.tanh(
        jnp.dot(first.astype(jnp.bfloat16).astype(jnp.float32),
                weight_bf16.astype(jnp.float32).T,
                precision=lax.Precision.HIGHEST)
        + bias)
    err = float(jnp.max(jnp.abs(out.astype(jnp.float32) - ref_bf16)))
    assert err < 1e-4, f"mismatch vs bf16-rounded reference: max abs err {err}"

    # Sanity check vs the full-f32 PyTorch-equivalent reference (loose tolerance:
    # operands are rounded to bf16 for the MXU).
    ref_f32 = jnp.tanh(
        jnp.dot(first, weight.T, precision=lax.Precision.HIGHEST) + bias)
    err32 = float(jnp.max(jnp.abs(out.astype(jnp.float32) - ref_f32)))
    assert err32 < 2e-2, f"mismatch vs f32 reference: max abs err {err32}"

    print("KERNEL_OK")
</pallas_src>

<mosaic_0001>
module attributes {stable_mosaic.version = 11 : i64} {
  func.func @_pooler_kernel(%arg0: i32, %arg1: memref<8x128xf32, #tpu.memory_space<vmem>>, %arg2: memref<128x128xbf16, #tpu.memory_space<vmem>>, %arg3: memref<1x128xf32, #tpu.memory_space<vmem>>, %arg4: memref<8x128xf32, #tpu.memory_space<vmem>>) attributes {dimension_semantics = [#tpu.dimension_semantics<parallel>], iteration_bounds = array<i64: 2>, scalar_prefetch = 0 : i64, scratch_operands = 0 : i64, tpu.core_type = #tpu.core_type<tc>, window_params = [{transform_indices = @transform_0, window_bounds = array<i64: 8, 128>}, {pipeline_mode = #tpu.pipeline_mode<synchronous>, transform_indices = @transform_1, window_bounds = array<i64: 128, 128>}, {pipeline_mode = #tpu.pipeline_mode<synchronous>, transform_indices = @transform_2, window_bounds = array<i64: 1, 128>}, {transform_indices = @transform_3, window_bounds = array<i64: 8, 128>}]} {
    %c0 = arith.constant 0 : index
    %c0_0 = arith.constant 0 : index
    %0 = vector.load %arg1[%c0, %c0_0] : memref<8x128xf32, #tpu.memory_space<vmem>>, vector<8x128xf32>
    %1 = arith.truncf %0 : vector<8x128xf32> to vector<8x128xbf16>
    %c0_1 = arith.constant 0 : index
    %c0_2 = arith.constant 0 : index
    %2 = vector.load %arg2[%c0_1, %c0_2] : memref<128x128xbf16, #tpu.memory_space<vmem>>, vector<128x128xbf16>
    %cst = arith.constant dense<0.000000e+00> : vector<8x128xf32>
    %3 = tpu.matmul %1, %2, %cst {dimension_numbers = #tpu.dot_dimension_numbers<[1], [1], [0], [0], [0, 0, 1, 0], [], []>} : vector<8x128xbf16>, vector<128x128xbf16>, vector<8x128xf32> -> vector<8x128xf32>
    %c0_3 = arith.constant 0 : index
    %c0_4 = arith.constant 0 : index
    %4 = vector.load %arg3[%c0_3, %c0_4] : memref<1x128xf32, #tpu.memory_space<vmem>>, vector<1x128xf32>
    %5 = vector.broadcast %4 : vector<1x128xf32> to vector<8x128xf32>
    %6 = arith.addf %3, %5 : vector<8x128xf32>
    %7 = math.tanh %6 : vector<8x128xf32>
    %c0_5 = arith.constant 0 : index
    %c0_6 = arith.constant 0 : index
    %8 = vector.load %arg4[%c0_5, %c0_6] : memref<8x128xf32, #tpu.memory_space<vmem>>, vector<8x128xf32>
    tpu.vector_store %arg4[%c0_5, %c0_6], %7 {strides = array<i32>} : memref<8x128xf32, #tpu.memory_space<vmem>>, vector<8x128xf32>,
    return
  }
  func.func @transform_0(%arg0: i32) -> (i32, i32) {
    %c0_i32 = arith.constant 0 : i32
    %c0_i32_0 = arith.constant 0 : i32
    return %arg0, %c0_i32 : i32, i32
  }
  func.func @transform_1(%arg0: i32) -> (i32, i32) {
    %c0_i32 = arith.constant 0 : i32
    %c0_i32_0 = arith.constant 0 : i32
    %c0_i32_1 = arith.constant 0 : i32
    return %c0_i32, %c0_i32_0 : i32, i32
  }
  func.func @transform_2(%arg0: i32) -> (i32, i32) {
    %c0_i32 = arith.constant 0 : i32
    %c0_i32_0 = arith.constant 0 : i32
    %c0_i32_1 = arith.constant 0 : i32
    return %c0_i32, %c0_i32_0 : i32, i32
  }
  func.func @transform_3(%arg0: i32) -> (i32, i32) {
    %c0_i32 = arith.constant 0 : i32
    %c0_i32_0 = arith.constant 0 : i32
    return %arg0, %c0_i32 : i32, i32
  }
}

</mosaic_0001>

<bundles_post_ra>
// kernel: tpu_custom_call.1
= control target key start
LH: loop header
LB: loop body
LE: loop exit
PB: predicated region body
PF: predicated region fallthrough
CT: control target
= control target key end

     0   :  { %8 = vsyncpa [#allocation3], 0  ;;  %s900_s0 = inlined_call_operand.hbm [shape: f32[16,1024], index: 0, kind: input, shape index: {}]   ;;  %s901_s1 = inlined_call_operand.hbm [shape: bf16[128,128], index: 1, kind: input, shape index: {}]   ;;  %s902_s2 = inlined_call_operand.vmem [shape: f32[1,128], index: 2, kind: input, shape index: {}]   ;;  %s903_s3 = inlined_call_operand.hbm [shape: f32[16,128], index: 3, kind: output, shape index: {}]  }
   0x1   :  { %10 = vsyncpa [#allocation3 + $0x1], 0 }
   0x2   :  { %11 = vsyncpa [#allocation6], 0 }
   0x3   :  { %12 = vsyncpa [#allocation4], 0 }
   0x4   :  { %14 = vsyncpa [#allocation4 + $0x1], 0  ;;  %s694_s12 = smov 0   ;;  %s696_s13 = smov 0  }
   0x5   :  { %s698_s14 = smov 0   ;;  %s700_s15 = smov 0  }
   0x6 LB: > { %s715_s16 = sadd.s32 4294967295, %s665_s15   ;;  %s412_s17 = sadd.s32 4294967294, %s665_s15   ;;  %s665_s15 = sphi %s700_s15, %s923_s15   ;;  %s661_s14 = sphi %s698_s14, %s922_s14   ;;  %s657_s13 = sphi %s696_s13, %s921_s13   ;;  %s653_s12 = sphi %s694_s12, %s920_s12  }
   0x7   : > { %p40_p0 = scmp.ne.s32.totalorder %s657_s13, %s653_s12  ;;  %p904_p1 = scmp.eq.s32.totalorder %s715_s16, 0 }
   0x8   : > { %p112_p3 = scmp.eq.s32.totalorder %s412_s17, 1  ;;  %p413_p5 = scmp.ge.s32.totalorder %s665_s15, 1 }
   0x9   : > { %p724_p4 = por %p904_p1, %p40_p0  ;;  %p119_p7 = scmp.lt.s32.totalorder %s665_s15, 3 }
   0xa   : > { %p729_p6 = por %p112_p3, %p40_p0  ;;  %s667_s21 = smov [#allocation5]  }
   0xb   : > { %s907_s18 = scalar_select %p724_p4, 1, 0 }
   0xc   : > { %s908_s19 = scalar_select %p729_p6, 1, 0 }
   0xd   : > { %p734_p8 = pnand %p413_p5, %p119_p7  ;;  %s131_s22 = sshll.u32 %s667_s21, 4  ;;  %s738_s22 = int_to_ptr.vmem [resolvable:$true] %s131_s22 }
   0xe   : > { %s750_s24 = sadd.s32 1, %s665_s15   ;;  %s27_s25 = sadd.s32 1, %s661_s14 }
   0xf   : > { %s909_s20 = scalar_select %p734_p8, 1, 0 }
  0x10   : > { %p474_p9 = pneg %p734_p8  ;;  %s24_s26 = ssub.s32 %s665_s15, %s750_s24 }
  0x11   : > { %s537_s29 = scalar_lea.hbm %s901_s1, 1024 }
  0x12   : > { %p745_p11 = pnand %p474_p9, %p904_p1  ;;  %p538_p12 = scmp.ne.s32.totalorder %s901_s1, %s537_s29 }
  0x13   : > { %p544_p5 = scmp.lt.u32.totalorder %s537_s29, %s901_s1 }
  0x14   : > { %p539_p13 = pneg %p745_p11 }
  0x16   : > { %p540_p0 = pnand %p539_p13, %p538_p12 }
  0x18   : > { %p541_p3 = pneg %p540_p0 }
  0x1a   : > { %p546_p7 = pnand %p544_p5, %p541_p3 }
  0x1c   : > { %549 = shalt.err (!%p546_p7)
}
  0x1d   : > { %s550_s7 = scalar_lea.vmem %s738_s22, 1024  ;;  %p558_p2 = scmp.lt.s32.totalorder %s738_s22, %s738_s22 }
  0x1e   : > { %p551_p9 = scmp.ne.s32.totalorder %s738_s22, %s550_s7  ;;  %p559_p6 = scmp.lt.s32.totalorder %s550_s7, %s550_s7 }
  0x20   : > { %p553_p10 = pnand %p551_p9, %p539_p13  ;;  %p560_p4 = por %p559_p6, %p558_p2 }
  0x22   : > { %p554_p1 = pneg %p553_p10 }
  0x24   : > { %p561_p8 = pnand %p560_p4, %p554_p1 }
  0x26   : > { %564 = shalt.err (!%p561_p8)
}
  0x27   : > { %s668_s8 = smov 64   ;;  %s669_s9 = smov 4  }
  0x28   : > { %477 = dma.hbm_to_vmem [thread:$0]  (!%p745_p11), %s901_s1, 1024, %s738_s22, [#allocation6], %s668_s8, %s668_s8, %s669_s9  }
  0x29   : > { %p25_p2 = scmp.eq.s32.totalorder %s24_s26, 0  ;;  %p34_p1 = scmp.ne.s32.totalorder %s661_s14, %s657_s13 }
  0x2a   : > { %p35_p4 = scmp.eq.s32.totalorder %s665_s15, 0  ;;  %p487_p6 = scmp.lt.s32.totalorder %s665_s15, 2 }
  0x2b   : > { %s781_s17 = scalar_select %p25_p2, %s661_s14, %s27_s25  }
  0x2c   : > { %p36_p8 = por %p35_p4, %p34_p1  ;;  %p911_p10 = scmp.eq.s32.totalorder %s715_s16, 1 }
  0x2d   : > { %s148_s27 = sand.u32 1, %s661_s14   ;;  %s436_s28 = sshll.u32 %s665_s15, 10 }
  0x2e   : > { %p785_p12 = por %p911_p10, %p34_p1  ;;  %s416_s29 = sshll.u32 %s148_s27, 3 }
  0x2f   : > { %s794_s4 = scalar_lea.hbm %s900_s0, %s436_s28  ;;  %s152_s22 = scalar_lea.vmem [#allocation2], %s416_s29 }
  0x30   : > { %s160_s25 = sshll.u32 %s152_s22, 4  ;;  %p796_p11 = pnand %p487_p6, %p36_p8  ;;  %s800_s25 = int_to_ptr.vmem [resolvable:$true] %s160_s25 }
  0x31   : > { %s149_s5 = scalar_lea.sflag [#allocation3], %s148_s27  ;;  %s565_s6 = scalar_lea.hbm %s794_s4, 128 }
  0x32   : > { %p566_p13 = scmp.ne.s32.totalorder %s794_s4, %s565_s6  ;;  %p567_p0 = pneg %p796_p11 }
  0x33   : > { %s570_s9 = scalar_lea.hbm %s900_s0, 2048  ;;  %p571_p7 = scmp.lt.u32.totalorder %s794_s4, %s900_s0 }
  0x34   : > { %p568_p3 = pnand %p567_p0, %p566_p13  ;;  %p572_p9 = scmp.lt.u32.totalorder %s570_s9, %s565_s6 }
  0x35   : > { %p574_p1 = scmp.lt.u32.totalorder %s565_s6, %s794_s4 }
  0x36   : > { %p569_p5 = pneg %p568_p3  ;;  %p573_p2 = por %p572_p9, %p571_p7 }
  0x38   : > { %p575_p4 = por %p574_p1, %p573_p2 }
  0x3a   : > { %p576_p6 = pnand %p575_p4, %p569_p5 }
  0x3c   : > { %579 = shalt.err (!%p576_p6)
}
  0x3d   : > { %s580_s27 = scalar_lea.vmem %s800_s25, 128  ;;  %s670_s28 = smov [#allocation2]  }
  0x3e   : > { %p581_p8 = scmp.ne.s32.totalorder %s800_s25, %s580_s27  ;;  %s585_s29 = sshll.u32 %s670_s28, 4  ;;  %s586_s29 = int_to_ptr.vmem [resolvable:$false] %s585_s29 }
  0x3f   : > { %s587_s23 = scalar_lea.vmem %s586_s29, 256  ;;  %p588_p3 = scmp.lt.s32.totalorder %s800_s25, %s586_s29 }
  0x40   : > { %p583_p10 = pnand %p581_p8, %p567_p0  ;;  %p589_p7 = scmp.lt.s32.totalorder %s587_s23, %s580_s27 }
  0x42   : > { %p584_p13 = pneg %p583_p10  ;;  %p590_p9 = por %p589_p7, %p588_p3 }
  0x44   : > { %p591_p2 = pnand %p590_p9, %p584_p13 }
  0x46   : > { %594 = shalt.err (!%p591_p2)
}
  0x47   : > { %481 = dma.hbm_to_vmem [thread:$0]  (!%p796_p11), %s794_s4, 128, %s800_s25, %s149_s5  }
  0x48   : > { %p914_p5 = scmp.ne.s32.totalorder %s909_s20, 0 }
  0x49   : > { %s830_s30 = sand.u32 (!%p914_p5), 1, %s657_s13   ;;  %p915_p0 = scmp.ne.s32.totalorder (!%p914_p5), %s907_s18, 0 }
  0x4a   : > { %169 = sbr.rel (%p914_p5) target bundleno = 389 (0x185), region = 32  ;;  %s420_s22 = sshll.u32 (!%p914_p5), %s830_s30, 3 }
  0x4b   : > { %s172_s6 = scalar_lea.sflag (!%p914_p5), [#allocation3], %s830_s30  ;;  %s836_s7 = scalar_lea.vmem (!%p914_p5), [#allocation2], %s420_s22 }
  0x51   : > { %640 = dma.done.wait (%p915_p0), %s172_s6, 128  }
  0x52   : > { %642 = vsyncadd (%p915_p0), %s172_s6, 4294967168  ;;  %p916_p11 = scmp.eq.s32.totalorder %s715_s16, 0 }
  0x54   : > { %644 = dma.done.wait (%p916_p11), [#allocation6], 1024   ;;  %p917_p1 = pmov %p916_p11 }
  0x55   : > { %v671_v0 = vmov 0.0   ;;  %vm672_vm0 = vmmov 0   ;;  %v527_v1 = vld [vmem:[#allocation5] sm:$0xff]   ;;  %v528_v2 = vld [vmem:[#allocation5 + $0x8] sm:$0xff]   ;;  %v529_v3 = vld [vmem:[#allocation5 + $0x10] sm:$0xff]   ;;  %s433_s4 = sshll.u32 %s715_s16, 7 }
  0x56   : > { %646 = vsyncadd (%p917_p1), [#allocation6], 4294966272  ;;  %446 = vmatprep.subr.bf16.mxu0 %v671_v0  ;;  %462 = vmatprep.mubr.msk.bf16.mxu0 %vm672_vm0, %v671_v0  ;;  %v530_v4 = vld [vmem:[#allocation5 + $0x18] sm:$0xff]   ;;  %v531_v5 = vld [vmem:[#allocation5 + $0x20] sm:$0xff]   ;;  %s201_s25 = scalar_lea.vmem [#allocation7], %s420_s22  ;;  %s856_s9 = scalar_lea.hbm %s903_s3, %s433_s4 }
  0x57   : > { %447 = vmatpush3.bf16.xpose.msra.mxu0 %v527_v1  ;;  %v532_v6 = vld [vmem:[#allocation5 + $0x28] sm:$0xff]   ;;  %v533_v7 = vld [vmem:[#allocation5 + $0x30] sm:$0xff]   ;;  %v534_v8 = vld [vmem:[#allocation5 + $0x38] sm:$0xff]   ;;  %s332_s26 = sshll.u32 %s201_s25, 4  ;;  %s319_s10 = scalar_lea.sflag [#allocation4], %s830_s30  ;;  %s858_s26 = int_to_ptr.vmem [resolvable:$true] %s332_s26 }
  0x58   : > { %448 = vmatprep.subr.bf16.mxu0 %v671_v0  ;;  %v203_v9 = vld [vmem:[%s836_s7] sm:$0xff]  ;;  %s595_s11 = scalar_lea.vmem %s858_s26, 128  ;;  %s673_s16 = smov [#allocation7]  }
  0x59   : > { %v204_v10 = vpack.c.bf16 %v203_v9, %v203_v9  ;;  %v423_v11 = vld [vmem:[%s902_s2] ss:$0 sm:$0xff]  ;;  %p596_p4 = scmp.ne.s32.totalorder %s858_s26, %s595_s11  ;;  %s599_s27 = sshll.u32 %s673_s16, 4  ;;  %s600_s27 = int_to_ptr.vmem [resolvable:$false] %s599_s27 }
  0x5a   : > { %s601_s28 = scalar_lea.vmem %s600_s27, 256  ;;  %p602_p10 = scmp.lt.s32.totalorder %s858_s26, %s600_s27 }
  0x5b   : > { %p597_p6 = pnand %p596_p4, %p785_p12  ;;  %p603_p13 = scmp.lt.s32.totalorder %s601_s28, %s595_s11 }
  0x5d   : > { %p598_p8 = pneg %p597_p6  ;;  %p604_p3 = por %p603_p13, %p602_p10 }
  0x5f   : > { %449 = vmatpush3.bf16.xpose.msra.mxu0 %v528_v2  ;;  %p605_p7 = pnand %p604_p3, %p598_p8 }
  0x60   : > { %450 = vmatprep.subr.bf16.mxu0 %v671_v0 }
  0x67   : > { %451 = vmatpush3.bf16.xpose.msra.mxu0 %v529_v3 }
  0x68   : > { %452 = vmatprep.subr.bf16.mxu0 %v671_v0 }
  0x6f   : > { %453 = vmatpush3.bf16.xpose.msra.mxu0 %v530_v4 }
  0x70   : > { %454 = vmatprep.subr.bf16.mxu0 %v671_v0 }
  0x77   : > { %455 = vmatpush3.bf16.xpose.msra.mxu0 %v531_v5 }
  0x78   : > { %456 = vmatprep.subr.bf16.mxu0 %v671_v0 }
  0x7f   : > { %457 = vmatpush3.bf16.xpose.msra.mxu0 %v532_v6 }
  0x80   : > { %458 = vmatprep.subr.bf16.mxu0 %v671_v0 }
  0x87   : > { %459 = vmatpush3.bf16.xpose.msra.mxu0 %v533_v7 }
  0x88   : > { %460 = vmatprep.subr.bf16.mxu0 %v671_v0 }
  0x8f   : > { %461 = vmatpush3.bf16.xpose.msra.mxu0 %v534_v8 }
  0x96   : > { %463 = vmatmul.mubr.bf16.vlgmr.msra.gmra.mrb[0].mxu0 %v204_v10 }
 0x169   : > { %v310_v12 = vpop.f32.mrb[0].mxu0 }
 0x16a   : > { %v311_v13 = vadd.f32 %v423_v11, %v310_v12  ;;  %v464_v14 = vpop.f32.mrb[1].mxu0 }
 0x16b   : > { %v313_v15 = vpop.f32.mrb[2].mxu0 }
 0x16c   : > { %535 = vtanh.f32 %v311_v13  ;;  %v465_v16 = vpop.f32.mrb[3].mxu0 }
 0x176   : > { %v536_v17 = vpop.eup %535 }
 0x177   : > { %317 = vst [vmem:[%s201_s25] sm:$0xff] %v536_v17 }
 0x178   : > { %608 = shalt.err (!%p605_p7)
}
 0x179   : > { %s609_s29 = scalar_lea.hbm %s856_s9, 128  ;;  %s613_s22 = scalar_lea.hbm %s903_s3, 256 }
 0x17a   : > { %p610_p9 = scmp.ne.s32.totalorder %s856_s9, %s609_s29  ;;  %p614_p0 = scmp.lt.u32.totalorder %s856_s9, %s903_s3 }
 0x17b   : > { %p615_p11 = scmp.lt.u32.totalorder %s613_s22, %s609_s29  ;;  %p617_p4 = scmp.lt.u32.totalorder %s609_s29, %s856_s9 }
 0x17c   : > { %p611_p2 = pnand %p610_p9, %p785_p12 }
 0x17d   : > { %p616_p1 = por %p615_p11, %p614_p0 }
 0x17e   : > { %p612_p5 = pneg %p611_p2 }
 0x17f   : > { %p618_p6 = por %p617_p4, %p616_p1 }
 0x181   : > { %p619_p8 = pnand %p618_p6, %p612_p5 }
 0x183   : > { %622 = shalt.err (!%p619_p8)
}
 0x184   : > { %472 = dma.vmem_to_hbm [thread:$0]  (%p785_p12), %s858_s26, 128, %s856_s9, %s319_s10  }
 0x185 PF: > { %s344_s18 = sand.u32 1, %s653_s12   ;;  %p918_p10 = scmp.ne.s32.totalorder %s908_s19, 0 }
 0x186   : > { %p919_p13 = scmp.ge.s32.totalorder %s665_s15, 2  ;;  %s345_s20 = scalar_lea.sflag [#allocation4], %s344_s18 }
 0x188   : > { %p483_p3 = pnand %p919_p13, %p918_p10 }
 0x18a   : > { %648 = dma.done.wait (!%p483_p3), %s345_s20, 128  }
 0x18b   : > { %650 = vsyncadd (!%p483_p3), %s345_s20, 4294967168  ;;  %p17_p7 = scmp.ge.s32.totalorder %s750_s24, 4   ;;  %s920_s12 = smov %s657_s13 }
 0x18c   : > { %s921_s13 = smov %s661_s14  ;;  %s922_s14 = smov %s781_s17 }
 0x18d   : > { %s923_s15 = smov %s750_s24  ;;  %19 = sbr.rel (!%p17_p7) target bundleno = 6 (0x6), region = 81 }
 0x194   :  { %350 = vsyncpa [#allocation3], 1 }
 0x195   :  { %352 = vsyncpa [#allocation3 + $0x1], 1 }
 0x196   :  { %353 = vsyncpa [#allocation6], 1 }
 0x197   :  { %354 = vsyncpa [#allocation4], 1 }
 0x198   :  { %356 = vsyncpa [#allocation4 + $0x1], 1 }

</bundles_post_ra>
